<compile_context>
chip_gen: v5e
topology: v5e:2x2
jax: 0.10.0
libtpu: 0.0.40
codegen_flags: <defaults>
</compile_context>

<pallas_src>
import jax
import jax.numpy as jnp
from jax.experimental import pallas as pl
from jax.experimental.pallas import tpu as pltpu


def _round_up(x, m):
    return ((x + m - 1) // m) * m


# ----------------------------------------------------------------------------
# Pallas kernel: one fused, N-tiled matmul for all heads
# ----------------------------------------------------------------------------

def _fused_heads_kernel(x_ref, w_ref, o_ref):
    # x_ref: (TILE_N, C), w_ref: (C, P_pad), o_ref: (TILE_N, P_pad)
    # Single K pass (C <= 256), f32 MXU accumulate, store in stream dtype.
    o_ref[...] = jnp.dot(
        x_ref[...], w_ref[...], preferred_element_type=jnp.float32
    ).astype(o_ref.dtype)


def _pick_tile_n(n, max_tile_n, min_grid):
    """Row-tile size: multiple of 8 (sublane), >= min_grid grid steps when
    possible (v7x has 2 TensorCores), and sized so the final partial block
    wastes at most 7 rows (no n_pad = round_up(N, tile_n) blow-up)."""
    n_steps = max(min_grid, pl.cdiv(n, max_tile_n))
    tile_n = _round_up(pl.cdiv(n, n_steps), 8)
    return max(8, min(max_tile_n, tile_n))


def fused_heads_matmul(feats, w_fused, *, out_dtype=None, max_tile_n=2048,
                       min_grid=2, vmem_limit_bytes=32 * 1024 * 1024):
    """feats (N, C) @ fused weights (C, P_pad) -> (N, P_pad).

    No padding of feats: the row grid uses pl.cdiv so the last block is
    partial (garbage rows feed only their own masked-out output rows -- safe
    because this kernel has no reduction over N).  The weight block index is
    constant across the grid, so the weights are DMA'd once and stay resident.
    """
    N, C = feats.shape
    C_w, P_pad = w_fused.shape
    assert C == C_w, (C, C_w)
    assert P_pad % 128 == 0
    if out_dtype is None:
        out_dtype = feats.dtype
    if N == 0:
        return jnp.zeros((0, P_pad), out_dtype)

    tile_n = _pick_tile_n(N, max_tile_n, min_grid)
    grid = (pl.cdiv(N, tile_n),)

    return pl.pallas_call(
        _fused_heads_kernel,
        out_shape=jax.ShapeDtypeStruct((N, P_pad), out_dtype),
        grid_spec=pltpu.PrefetchScalarGridSpec(
            num_scalar_prefetch=0,
            grid=grid,
            in_specs=[
                # (tile_n, C): last dim == full array dim, so C=96 is legal
                # without padding; tile_n is a multiple of 8.
                pl.BlockSpec((tile_n, C), lambda i: (i, 0)),
                # Whole weight matrix, resident across all grid steps.
                pl.BlockSpec((C, P_pad), lambda i: (0, 0)),
            ],
            out_specs=pl.BlockSpec((tile_n, P_pad), lambda i: (i, 0)),
        ),
        compiler_params=pltpu.CompilerParams(
            dimension_semantics=("parallel",),
            vmem_limit_bytes=vmem_limit_bytes,
        ),
    )(feats, w_fused)


# ----------------------------------------------------------------------------
# Module wrapper (parameter setup / slicing = glue in plain JAX)
# ----------------------------------------------------------------------------

class MultiHeadMinkUnetPallas:
    def __init__(self, num_labeled, num_unlabeled, overcluster_factor=None,
                 num_heads=1, feat_dim=96, stream_dtype=jnp.bfloat16,
                 materialize_proj_feats=True, key=None):
        # feat_dim = MinkUNet34C.final.in_channels (96 for MinkUNet34C).
        self.feat_dim = feat_dim
        self.num_heads = num_heads
        self.num_labeled = num_labeled
        self.num_unlabeled = num_unlabeled
        self.overcluster_factor = overcluster_factor
        self.stream_dtype = stream_dtype
        # True  -> proj_feats_* have the PyTorch shape (H, N, C) (H HBM copies
        #          sharing ONE broadcast between unlab / unlab_over).
        # False -> proj_feats_* is just feats (N, C); consumers broadcast
        #          lazily (recommended; saves ~H*N*C*bytes of HBM writes).
        self.materialize_proj_feats = materialize_proj_feats

        if key is None:
            key = jax.random.PRNGKey(0)
        k_lab, k_un, k_over = jax.random.split(key, 3)
        scale = 1.0 / jnp.sqrt(jnp.float32(feat_dim))

        # head_lab: Prototypes(feat_dim -> num_labeled), 1x1 conv, no bias.
        self.w_lab = scale * jax.random.normal(
            k_lab, (feat_dim, num_labeled), jnp.float32)

        # head_unlab: MultiHead of num_heads Prototypes(feat_dim -> num_unlabeled)
        self.w_unlab = None
        if num_heads is not None:
            self.w_unlab = scale * jax.random.normal(
                k_un, (num_heads, feat_dim, num_unlabeled), jnp.float32)

        # head_unlab_over
        self.w_unlab_over = None
        if overcluster_factor is not None:
            self.w_unlab_over = scale * jax.random.normal(
                k_over,
                (num_heads, feat_dim, num_unlabeled * overcluster_factor),
                jnp.float32)

        self._build_fused_weights()

    def _build_fused_weights(self):
        """Concatenate all head weights along the output dim; pad only P."""
        cols = [self.w_lab]
        segments = [("lab", self.num_labeled)]
        if self.w_unlab is not None:
            H, C, Pu = self.w_unlab.shape
            cols.append(jnp.transpose(self.w_unlab, (1, 0, 2)).reshape(C, H * Pu))
            segments.append(("unlab", H * Pu))
        if self.w_unlab_over is not None:
            H, C, Po = self.w_unlab_over.shape
            cols.append(jnp.transpose(self.w_unlab_over, (1, 0, 2)).reshape(C, H * Po))
            segments.append(("unlab_over", H * Po))

        w_all = jnp.concatenate(cols, axis=-1)          # (feat_dim, P_total)
        self.p_total = w_all.shape[-1]
        self._segments = segments

        # Pad only the output dim to a multiple of 128 (lane-dense stores).
        # K stays at the true feat_dim -- no extra input bytes.
        p_pad = _round_up(self.p_total, 128)
        w_fused = jnp.pad(w_all, ((0, 0), (0, p_pad - self.p_total)))
        # Weights pre-cast once to the streaming dtype (bf16 is the native MXU
        # datapath); zero per-forward cast cost.
        self.w_fused = w_fused.astype(self.stream_dtype)

    # -- shared slicing of the fused kernel output --------------------------
    def _split_segments(self, logits_all, n_rows, lead_shape=()):
        """Slice per-head segments straight out of the (rows, P_pad) output."""
        out = {}
        off = 0
        for name, width in self._segments:
            seg = logits_all[:, off:off + width]
            off += width
            if name == "lab":
                out["logits_lab"] = seg.reshape(lead_shape + (n_rows, width))
            else:
                H = self.num_heads
                ph = width // H
                seg = seg.reshape(lead_shape + (n_rows, H, ph))
                # (..., N, H, P) -> (..., H, N, P)
                perm = tuple(range(len(lead_shape))) + (
                    len(lead_shape) + 1, len(lead_shape), len(lead_shape) + 2)
                out["logits_" + name] = jnp.transpose(seg, perm)
        return out

    # -- single feature matrix ----------------------------------------------
    def forward_heads(self, feats):
        N = feats.shape[0]
        # bf16 at the call boundary; under jit this cast fuses with the
        # producing op (the encoder), so it does not add an HBM pass.
        x = feats.astype(self.stream_dtype)
        logits_all = fused_heads_matmul(x, self.w_fused,
                                        out_dtype=self.stream_dtype)
        out = self._split_segments(logits_all, N)

        if self.w_unlab is not None or self.w_unlab_over is not None:
            src = self.w_unlab if self.w_unlab is not None else self.w_unlab_over
            H = src.shape[0]
            if self.materialize_proj_feats:
                proj = jnp.broadcast_to(feats[None], (H,) + feats.shape)
            else:
                proj = feats  # consumers broadcast lazily; no H-way HBM copy
            if self.w_unlab is not None:
                out["proj_feats_unlab"] = proj
            if self.w_unlab_over is not None:
                out["proj_feats_unlab_over"] = proj
        return out

    # -- full forward ---------------------------------------------------------
    def forward(self, views):
        # `views` is either a list of feature matrices (multi-view) or a single
        # (N, C) feature matrix (the sparse encoder output; see TODO(synk)).
        if isinstance(views, (list, tuple)):
            feats_list = [jnp.asarray(v) for v in views]
            V = len(feats_list)
            N = feats_list[0].shape[0]
            assert all(f.shape == (N, self.feat_dim) for f in feats_list)
            # ONE pallas_call for all views: concat along N (one weight DMA,
            # one launch, one pipeline warmup).
            feats_all = jnp.concatenate(feats_list, axis=0)      # (V*N, C)
            x = feats_all.astype(self.stream_dtype)
            logits_all = fused_heads_matmul(x, self.w_fused,
                                            out_dtype=self.stream_dtype)
            logits_all = logits_all.reshape(V, N, -1).reshape(V * N, -1) \
                if False else logits_all  # (kept flat; split below per view)

            out_dict = {"feats": feats_all.reshape(V, N, self.feat_dim)}
            # Segment slices straight from the padded output, then view-split.
            seg_out = self._split_segments(
                logits_all.reshape(V, N, -1).reshape(V * N, -1), N,
                lead_shape=(V,)) if False else None
            # Simpler path: reshape rows to (V, N) per segment.
            off = 0
            for name, width in self._segments:
                seg = logits_all[:, off:off + width]
                off += width
                if name == "lab":
                    out_dict["logits_lab"] = seg.reshape(V, N, width)
                else:
                    H = self.num_heads
                    ph = width // H
                    out_dict["logits_" + name] = jnp.transpose(
                        seg.reshape(V, N, H, ph), (0, 2, 1, 3))

            if self.w_unlab is not None or self.w_unlab_over is not None:
                src = self.w_unlab if self.w_unlab is not None else self.w_unlab_over
                H = src.shape[0]
                if self.materialize_proj_feats:
                    proj = jnp.broadcast_to(
                        feats_all.reshape(V, 1, N, self.feat_dim),
                        (V, H, N, self.feat_dim))
                else:
                    proj = out_dict["feats"]
                if self.w_unlab is not None:
                    out_dict["proj_feats_unlab"] = proj
                if self.w_unlab_over is not None:
                    out_dict["proj_feats_unlab_over"] = proj
            return out_dict
        else:
            feats = views
            out = self.forward_heads(feats)
            out["feats"] = feats
            return out


# ----------------------------------------------------------------------------
# Demo / correctness check
# ----------------------------------------------------------------------------

if __name__ == "__main__":
    key = jax.random.PRNGKey(0)
    k_feats, k_feats2, k_v0, k_v1, k_params = jax.random.split(key, 5)

    N = 128          # number of active points in the sparse tensor
    FEAT_DIM = 96    # MinkUNet34C final.in_channels
    NUM_LABELED = 10
    NUM_UNLABELED = 16
    NUM_HEADS = 3
    OVERCLUSTER = 2

    model = MultiHeadMinkUnetPallas(
        num_labeled=NUM_LABELED,
        num_unlabeled=NUM_UNLABELED,
        overcluster_factor=OVERCLUSTER,
        num_heads=NUM_HEADS,
        feat_dim=FEAT_DIM,
        key=k_params,
    )

    def ref_matmul(x, w):
        # Same numerics as the kernel: bf16 streaming, f32 MXU accumulate.
        return jnp.dot(x.astype(jnp.bfloat16), w.astype(jnp.bfloat16),
                       preferred_element_type=jnp.float32)

    def close(a, b, atol=1e-2, rtol=1e-2):
        return bool(jnp.allclose(jnp.asarray(a, jnp.float32),
                                 jnp.asarray(b, jnp.float32),
                                 atol=atol, rtol=rtol))

    # --- single view, aligned N ---
    feats = jax.random.normal(k_feats, (N, FEAT_DIM), jnp.float32)
    out = model.forward(feats)
    out = jax.tree_util.tree_map(jax.block_until_ready, out)

    ref_lab = ref_matmul(feats, model.w_lab)
    ref_unlab = jnp.stack([ref_matmul(feats, model.w_unlab[h])
                           for h in range(NUM_HEADS)])
    ref_over = jnp.stack([ref_matmul(feats, model.w_unlab_over[h])
                          for h in range(NUM_HEADS)])

    assert out["logits_lab"].shape == (N, NUM_LABELED)
    assert out["logits_unlab"].shape == (NUM_HEADS, N, NUM_UNLABELED)
    assert out["logits_unlab_over"].shape == (NUM_HEADS, N,
                                              NUM_UNLABELED * OVERCLUSTER)
    assert out["proj_feats_unlab"].shape == (NUM_HEADS, N, FEAT_DIM)
    assert out["proj_feats_unlab_over"].shape == (NUM_HEADS, N, FEAT_DIM)
    assert out["feats"].shape == (N, FEAT_DIM)

    assert close(out["logits_lab"], ref_lab)
    assert close(out["logits_unlab"], ref_unlab)
    assert close(out["logits_unlab_over"], ref_over)
    # Loose check vs. pure-f32 reference (bf16 streaming changes numerics).
    assert close(out["logits_lab"], feats @ model.w_lab, atol=5e-2, rtol=5e-2)
    assert close(out["proj_feats_unlab"],
                 jnp.broadcast_to(feats[None], (NUM_HEADS, N, FEAT_DIM)),
                 atol=0.0, rtol=0.0)

    # --- single view, irregular N (exercises the partial last block) ---
    N2 = 77
    feats2 = jax.random.normal(k_feats2, (N2, FEAT_DIM), jnp.float32)
    out2 = model.forward(feats2)
    out2 = jax.tree_util.tree_map(jax.block_until_ready, out2)
    assert out2["logits_lab"].shape == (N2, NUM_LABELED)
    assert out2["logits_unlab"].shape == (NUM_HEADS, N2, NUM_UNLABELED)
    assert close(out2["logits_lab"], ref_matmul(feats2, model.w_lab))
    assert close(out2["logits_unlab"],
                 jnp.stack([ref_matmul(feats2, model.w_unlab[h])
                            for h in range(NUM_HEADS)]))

    # --- multi-view list path: ONE fused pallas_call for all views ---
    NV = 64
    v0 = jax.random.normal(k_v0, (NV, FEAT_DIM), jnp.float32)
    v1 = jax.random.normal(k_v1, (NV, FEAT_DIM), jnp.float32)
    outv = model.forward([v0, v1])
    outv = jax.tree_util.tree_map(jax.block_until_ready, outv)
    assert outv["feats"].shape == (2, NV, FEAT_DIM)
    assert outv["logits_lab"].shape == (2, NV, NUM_LABELED)
    assert outv["logits_unlab"].shape == (2, NUM_HEADS, NV, NUM_UNLABELED)
    assert outv["proj_feats_unlab"].shape == (2, NUM_HEADS, NV, FEAT_DIM)
    assert close(outv["logits_lab"][0], ref_matmul(v0, model.w_lab))
    assert close(outv["logits_lab"][1], ref_matmul(v1, model.w_lab))
    assert close(outv["logits_unlab"][1],
                 jnp.stack([ref_matmul(v1, model.w_unlab[h])
                            for h in range(NUM_HEADS)]))

    print("KERNEL_OK")
</pallas_src>

<mosaic_0001>
module attributes {stable_mosaic.version = 11 : i64} {
  func.func @_fused_heads_kernel(%arg0: i32, %arg1: memref<64x96xbf16, #tpu.memory_space<vmem>>, %arg2: memref<96x256xbf16, #tpu.memory_space<vmem>>, %arg3: memref<64x256xbf16, #tpu.memory_space<vmem>>) attributes {dimension_semantics = [#tpu.dimension_semantics<parallel>], iteration_bounds = array<i64: 2>, scalar_prefetch = 0 : i64, scratch_operands = 0 : i64, tpu.core_type = #tpu.core_type<tc>, window_params = [{transform_indices = @transform_0, window_bounds = array<i64: 64, 96>}, {pipeline_mode = #tpu.pipeline_mode<synchronous>, transform_indices = @transform_1, window_bounds = array<i64: 96, 256>}, {transform_indices = @transform_2, window_bounds = array<i64: 64, 256>}]} {
    %c0 = arith.constant 0 : index
    %c0_0 = arith.constant 0 : index
    %0 = vector.load %arg1[%c0, %c0_0] : memref<64x96xbf16, #tpu.memory_space<vmem>>, vector<64x96xbf16>
    %c0_1 = arith.constant 0 : index
    %c0_2 = arith.constant 0 : index
    %1 = vector.load %arg2[%c0_1, %c0_2] : memref<96x256xbf16, #tpu.memory_space<vmem>>, vector<96x256xbf16>
    %cst = arith.constant dense<0.000000e+00> : vector<64x256xf32>
    %2 = tpu.matmul %0, %1, %cst {dimension_numbers = #tpu.dot_dimension_numbers<[1], [0], [0], [1], [0, 0, 1, 1], [], []>} : vector<64x96xbf16>, vector<96x256xbf16>, vector<64x256xf32> -> vector<64x256xf32>
    %3 = arith.truncf %2 : vector<64x256xf32> to vector<64x256xbf16>
    %c0_3 = arith.constant 0 : index
    %c0_4 = arith.constant 0 : index
    %4 = vector.load %arg3[%c0_3, %c0_4] : memref<64x256xbf16, #tpu.memory_space<vmem>>, vector<64x256xbf16>
    tpu.vector_store %arg3[%c0_3, %c0_4], %3 {strides = array<i32>} : memref<64x256xbf16, #tpu.memory_space<vmem>>, vector<64x256xbf16>,
    return
  }
  func.func @transform_0(%arg0: i32) -> (i32, i32) {
    %c0_i32 = arith.constant 0 : i32
    %c0_i32_0 = arith.constant 0 : i32
    return %arg0, %c0_i32 : i32, i32
  }
  func.func @transform_1(%arg0: i32) -> (i32, i32) {
    %c0_i32 = arith.constant 0 : i32
    %c0_i32_0 = arith.constant 0 : i32
    %c0_i32_1 = arith.constant 0 : i32
    return %c0_i32, %c0_i32_0 : i32, i32
  }
  func.func @transform_2(%arg0: i32) -> (i32, i32) {
    %c0_i32 = arith.constant 0 : i32
    %c0_i32_0 = arith.constant 0 : i32
    return %arg0, %c0_i32 : i32, i32
  }
}

</mosaic_0001>

<bundles_post_ra>
// kernel: tpu_custom_call.1
= control target key start
LH: loop header
LB: loop body
LE: loop exit
PB: predicated region body
PF: predicated region fallthrough
CT: control target
= control target key end

     0   :  { %7 = vsyncpa [#allocation3], 0  ;;  %s820_s0 = inlined_call_operand.vmem [shape: bf16[128,96], index: 0, kind: input, shape index: {}]   ;;  %s821_s1 = inlined_call_operand.vmem [shape: bf16[96,256], index: 1, kind: input, shape index: {}]   ;;  %s822_s2 = inlined_call_operand.hbm [shape: bf16[128,256], index: 2, kind: output, shape index: {}]  }
   0x1   :  { %9 = vsyncpa [#allocation3 + $0x1], 0  ;;  %s649_s9 = smov 0   ;;  %s651_s10 = smov 0  }
   0x2   :  { %s653_s11 = smov 0   ;;  %s655_s12 = smov 0  }
   0x3 LB: > { %s670_s13 = sadd.s32 4294967295, %s630_s12   ;;  %s412_s14 = sadd.s32 4294967294, %s630_s12   ;;  %s630_s12 = sphi %s655_s12, %s828_s12   ;;  %s626_s11 = sphi %s653_s11, %s827_s11   ;;  %s622_s10 = sphi %s651_s10, %s826_s10   ;;  %s618_s9 = sphi %s649_s9, %s825_s9  }
   0x4   : > { %s674_s15 = sadd.s32 1, %s630_s12   ;;  %s69_s16 = sadd.s32 1, %s626_s11 }
   0x5   : > { %s66_s17 = ssub.s32 %s630_s12, %s674_s15  ;;  %p79_p0 = scmp.ne.s32.totalorder %s626_s11, %s622_s10 }
   0x6   : > { %p67_p1 = scmp.eq.s32.totalorder %s66_s17, 0  ;;  %p80_p2 = scmp.eq.s32.totalorder %s670_s13, 1 }
   0x7   : > { %p85_p3 = scmp.ne.s32.totalorder %s622_s10, %s618_s9  ;;  %p86_p4 = scmp.eq.s32.totalorder %s412_s14, 1 }
   0x8   : > { %s685_s18 = scalar_select %p67_p1, %s626_s11, %s69_s16  }
   0x9   : > { %p687_p5 = por %p80_p2, %p79_p0  ;;  %p691_p6 = por %p86_p4, %p85_p3 }
   0xa   : > { %p415_p7 = scmp.ge.s32.totalorder %s630_s12, 1  ;;  %p116_p8 = scmp.lt.s32.totalorder %s630_s12, 3 }
   0xc   : > { %p117_p9 = pnand %p415_p7, %p116_p8 }
   0xd   : > { %s417_s30 = sshll.u32 (!%p117_p9), %s670_s13, 3  ;;  %s514_s17 = sshll.u32 (!%p117_p9), %s670_s13, 6 }
   0xe   : > { %120 = sbr.rel (%p117_p9) target bundleno = 208 (0xd0), region = 28  ;;  %p139_p10 = scmp.lt.s32.totalorder (!%p117_p9), %s417_s30, 15 }
   0xf   : > { %s346_s23 = scalar_lea.hbm (!%p117_p9), %s822_s2, %s514_s17  ;;  %s588_s3 = scalar_lea.hbm (!%p117_p9), %s822_s2, 128 }
  0x10   : > { %s349_s25 = sshll.u32 (!%p117_p9), %s346_s23, 4  ;;  %s350_s25 = int_to_ptr.hbm [resolvable:$true] %s349_s25 }
  0x11   : > { %s582_s26 = sshra.s32 (!%p117_p9), %s350_s25, 4  ;;  %s583_s26 = int_to_ptr.hbm [resolvable:$true] %s582_s26 }
  0x12   : > { %s584_s27 = scalar_lea.hbm (!%p117_p9), %s583_s26, 64  ;;  %p589_p0 = scmp.lt.s32.totalorder (!%p117_p9), %s583_s26, %s822_s2 }
  0x13   : > { %v477_v0 = vld [vmem:[%s821_s1 + $0x50] sm:$0xf]  ;;  %v512_v1 = vld [vmem:[%s821_s1 + $0x54] sm:$0xf0]  ;;  %v511_v2 = vld [vmem:[%s821_s1 + $0x54] sm:$0xf]  ;;  %p585_p11 = scmp.ne.s32.totalorder %s583_s26, %s584_s27  ;;  %p590_p1 = scmp.lt.s32.totalorder %s588_s3, %s584_s27 }
  0x14   : > { %v478_v3 = vor.u32 %v512_v1, %v477_v0  ;;  %v479_v4 = vld [vmem:[%s821_s1 + $0x58] sm:$0xf0]  ;;  %v469_v5 = vld [vmem:[%s821_s1 + $0x40] sm:$0xf]  ;;  %v510_v6 = vld [vmem:[%s821_s1 + $0x44] sm:$0xf0] }
  0x15   : > { %v482_v7 = vor.u32 %v511_v2, %v479_v4  ;;  %v509_v8 = vld [vmem:[%s821_s1 + $0x44] sm:$0xf]  ;;  %v471_v9 = vld [vmem:[%s821_s1 + $0x48] sm:$0xf0]  ;;  %v470_v10 = vor.u32 %v510_v6, %v469_v5  ;;  %v461_v12 = vld [vmem:[%s821_s1 + $0x30] sm:$0xf]  ;;  %p586_p12 = pnand %p585_p11, %p687_p5  ;;  %p591_p2 = por %p590_p1, %p589_p0 }
  0x16   : > { %261 = vmatpush.bf16.msra.mxu0 %v478_v3  ;;  %515 = vmatpush.bf16.msra.mxu2 %v478_v3  ;;  %v474_v11 = vor.u32 %v509_v8, %v471_v9  ;;  %v508_v13 = vld [vmem:[%s821_s1 + $0x34] sm:$0xf0]  ;;  %v507_v14 = vld [vmem:[%s821_s1 + $0x34] sm:$0xf]  ;;  %v463_v15 = vld [vmem:[%s821_s1 + $0x38] sm:$0xf0] }
  0x17   : > { %290 = vmatpush.bf16.msra.mxu1 %v482_v7  ;;  %521 = vmatpush.bf16.msra.mxu3 %v482_v7  ;;  %v462_v16 = vor.u32 %v508_v13, %v461_v12  ;;  %v466_v17 = vor.u32 %v507_v14, %v463_v15  ;;  %v453_v18 = vld [vmem:[%s821_s1 + $0x20] sm:$0xf]  ;;  %v506_v19 = vld [vmem:[%s821_s1 + $0x24] sm:$0xf0]  ;;  %v505_v20 = vld [vmem:[%s821_s1 + $0x24] sm:$0xf]  ;;  %p587_p13 = pneg %p586_p12 }
  0x18   : > { %v455_v21 = vld [vmem:[%s821_s1 + $0x28] sm:$0xf0]  ;;  %v454_v22 = vor.u32 %v506_v19, %v453_v18  ;;  %v445_v24 = vld [vmem:[%s821_s1 + $0x10] sm:$0xf]  ;;  %v504_v25 = vld [vmem:[%s821_s1 + $0x14] sm:$0xf0] }
  0x19   : > { %v458_v23 = vor.u32 %v505_v20, %v455_v21  ;;  %s830_s30 = smov (!%p139_p10, %s417_s30), 15  ;;  %v503_v26 = vld [vmem:[%s821_s1 + $0x14] sm:$0xf]  ;;  %v447_v27 = vld [vmem:[%s821_s1 + $0x18] sm:$0xf0]  ;;  %v446_v28 = vor.u32 %v504_v25, %v445_v24  ;;  %vm246_vm0 = vcmask 785408   ;;  %p592_p3 = pnand %p591_p2, %p587_p13 }
  0x1a   : > { %262 = vmatpush.bf16.msra.mxu0 %v470_v10  ;;  %516 = vmatpush.bf16.msra.mxu2 %v470_v10  ;;  %v450_v29 = vor.u32 %v503_v26, %v447_v27  ;;  %v437_v30 = vld [vmem:[%s821_s1] sm:$0xf]  ;;  %v502_v31 = vld [vmem:[%s821_s1 + $0x4] sm:$0xf0]  ;;  %s418_s28 = sshll.u32 %s830_s30, 2  ;;  %s135_s30 = sand.u32 1, %s622_s10  }
  0x1b   : > { %291 = vmatpush.bf16.msra.mxu1 %v474_v11  ;;  %522 = vmatpush.bf16.msra.mxu3 %v474_v11  ;;  %v501_v32 = vld [vmem:[%s821_s1 + $0x4] sm:$0xf]  ;;  %v439_v33 = vld [vmem:[%s821_s1 + $0x8] sm:$0xf0]  ;;  %v438_v34 = vor.u32 %v502_v31, %v437_v30  ;;  %s142_s8 = scalar_lea.vmem %s820_s0, %s418_s28  ;;  %s416_s14 = sshll.u32 %s135_s30, 6 }
  0x1c   : > { %v442_v35 = vor.u32 %v501_v32, %v439_v33  ;;  %v497_v36 = vld [vmem:[%s142_s8] sm:$0xff]  ;;  %v499_v37 = vld [vmem:[%s142_s8 + $0x10] sm:$0xff]  ;;  %v498_v38 = vld [vmem:[%s142_s8 + $0x8] sm:$0xff]  ;;  %s776_s16 = scalar_lea.vmem [#allocation2], %s416_s14  ;;  %s334_s13 = scalar_lea.sflag [#allocation3], %s135_s30 }
  0x1d   : > { %v500_v39 = vld [vmem:[%s142_s8 + $0x18] sm:$0xff]  ;;  %s347_s24 = sshll.u32 %s776_s16, 4  ;;  %s348_s24 = int_to_ptr.vmem [resolvable:$true] %s347_s24 }
  0x1e   : > { %263 = vmatpush.bf16.msra.mxu0 %v462_v16  ;;  %517 = vmatpush.bf16.msra.mxu2 %v462_v16 }
  0x1f   : > { %292 = vmatpush.bf16.msra.mxu1 %v466_v17  ;;  %523 = vmatpush.bf16.msra.mxu3 %v466_v17 }
  0x22   : > { %264 = vmatpush.bf16.msra.mxu0 %v454_v22  ;;  %518 = vmatpush.bf16.msra.mxu2 %v454_v22 }
  0x23   : > { %293 = vmatpush.bf16.msra.mxu1 %v458_v23  ;;  %524 = vmatpush.bf16.msra.mxu3 %v458_v23 }
  0x26   : > { %265 = vmatpush.bf16.msra.mxu0 %v446_v28  ;;  %519 = vmatpush.bf16.msra.mxu2 %v446_v28 }
  0x27   : > { %294 = vmatpush.bf16.msra.mxu1 %v450_v29  ;;  %525 = vmatpush.bf16.msra.mxu3 %v450_v29 }
  0x2a   : > { %266 = vmatpush.bf16.msra.mxu0 %v438_v34  ;;  %520 = vmatpush.bf16.msra.mxu2 %v438_v34 }
  0x2b   : > { %295 = vmatpush.bf16.msra.mxu1 %v442_v35  ;;  %526 = vmatpush.bf16.msra.mxu3 %v442_v35 }
  0x2d   : > { %483 = vmatmul.msk.bf16.vlgmr.msra.gmra.mxu0 %vm246_vm0, %v497_v36  ;;  %485 = vmatmul.msk.bf16.vlgmr.msra.gmra.mxu2 %vm246_vm0, %v499_v37 }
  0x2e   : > { %487 = vmatmul.msk.bf16.vlgmr.msra.gmra.mxu1 %vm246_vm0, %v497_v36  ;;  %489 = vmatmul.msk.bf16.vlgmr.msra.gmra.mxu3 %vm246_vm0, %v499_v37 }
  0x3d   : > { %484 = vmatmul.msk.bf16.gmra.mxu0 %vm246_vm0, %v498_v38  ;;  %486 = vmatmul.msk.bf16.gmra.mxu2 %vm246_vm0, %v500_v39 }
  0x3e   : > { %488 = vmatmul.msk.bf16.gmra.mxu1 %vm246_vm0, %v498_v38  ;;  %490 = vmatmul.msk.bf16.gmra.mxu3 %vm246_vm0, %v500_v39 }
  0xaa   : > { %v268_v40 = vpop.f32.mrf.mxu0 }
  0xab   : > { %v297_v41 = vpop.f32.mrf.mxu1 }
  0xac   : > { %v317_v42 = vpack.c.bf16 %v297_v41, %v268_v40 }
  0xae   : > { %325 = vst [vmem:[%s776_s16] sm:$0xff] %v317_v42 }
  0xb0   : > { %v278_v43 = vpop.f32.mrf.mxu2 }
  0xb1   : > { %v307_v44 = vpop.f32.mrf.mxu3 }
  0xb2   : > { %v321_v45 = vpack.c.bf16 %v307_v44, %v278_v43  ;;  %v270_v46 = vpop.f32.mrf.mxu0 }
  0xb3   : > { %v299_v47 = vpop.f32.mrf.mxu1 }
  0xb4   : > { %329 = vst [vmem:[%s776_s16 + $0x20] sm:$0xff] %v321_v45  ;;  %v318_v48 = vpack.c.bf16 %v299_v47, %v270_v46 }
  0xb6   : > { %326 = vst [vmem:[%s776_s16 + $0x8] sm:$0xff] %v318_v48 }
  0xb8   : > { %v280_v49 = vpop.f32.mrf.mxu2 }
  0xb9   : > { %v309_v50 = vpop.f32.mrf.mxu3 }
  0xba   : > { %v322_v51 = vpack.c.bf16 %v309_v50, %v280_v49  ;;  %v273_v52 = vpop.f32.mrf.mxu0 }
  0xbb   : > { %v302_v53 = vpop.f32.mrf.mxu1 }
  0xbc   : > { %330 = vst [vmem:[%s776_s16 + $0x28] sm:$0xff] %v322_v51  ;;  %v319_v54 = vpack.c.bf16 %v302_v53, %v273_v52 }
  0xbe   : > { %327 = vst [vmem:[%s776_s16 + $0x10] sm:$0xff] %v319_v54 }
  0xc0   : > { %v283_v55 = vpop.f32.mrf.mxu2 }
  0xc1   : > { %v312_v56 = vpop.f32.mrf.mxu3 }
  0xc2   : > { %v323_v57 = vpack.c.bf16 %v312_v56, %v283_v55  ;;  %v275_v58 = vpop.f32.mrf.mxu0 }
  0xc3   : > { %v304_v59 = vpop.f32.mrf.mxu1 }
  0xc4   : > { %331 = vst [vmem:[%s776_s16 + $0x30] sm:$0xff] %v323_v57  ;;  %v320_v60 = vpack.c.bf16 %v304_v59, %v275_v58 }
  0xc6   : > { %328 = vst [vmem:[%s776_s16 + $0x18] sm:$0xff] %v320_v60 }
  0xc8   : > { %v285_v61 = vpop.f32.mrf.mxu2 }
  0xc9   : > { %v314_v62 = vpop.f32.mrf.mxu3 }
  0xca   : > { %v324_v63 = vpack.c.bf16 %v314_v62, %v285_v61 }
  0xcc   : > { %332 = vst [vmem:[%s776_s16 + $0x38] sm:$0xff] %v324_v63 }
  0xcd   : > { %595 = shalt.err (!%p592_p3)
}
  0xce   : > { %s632_s6 = smov 128   ;;  %s633_s7 = smov 8  }
  0xcf   : > { %527 = dma.vmem_to_hbm [thread:$0]  (%p687_p5), %s348_s24, 1024, %s350_s25, %s334_s13, %s632_s6, %s632_s6, %s633_s7  }
  0xd0 PF: > { %p533_p4 = scmp.ge.s32.totalorder %s630_s12, 2  ;;  %s364_s8 = sand.u32 1, %s618_s9  }
  0xd1   : > { %s365_s30 = scalar_lea.sflag [#allocation3], %s364_s8 }
  0xd2   : > { %p530_p7 = pnand %p533_p4, %p691_p6 }
  0xd4   : > { %p531_p8 = pneg %p530_p7 }
  0xd6   : > { %613 = dma.done.wait (%p531_p8), %s365_s30, 1024  }
  0xd7   : > { %615 = vsyncadd (%p531_p8), %s365_s30, 4294966272  ;;  %p12_p9 = scmp.ge.s32.totalorder %s674_s15, 4   ;;  %s825_s9 = smov %s622_s10 }
  0xd8   : > { %s826_s10 = smov %s626_s11  ;;  %s827_s11 = smov %s685_s18 }
  0xd9   : > { %s828_s12 = smov %s674_s15  ;;  %14 = sbr.rel (!%p12_p9) target bundleno = 3 (0x3), region = 63 }
  0xde   :  { %371 = vsyncpa [#allocation3], 1 }
  0xdf   :  { %373 = vsyncpa [#allocation3 + $0x1], 1 }

</bundles_post_ra>
